<compile_context>
chip_gen: v7x
topology: tpu7x:2x2x1
jax: 0.10.0
libtpu: 0.0.40
codegen_flags: <defaults>
</compile_context>

<pallas_src>
import math

import jax
import jax.numpy as jnp
from jax.experimental import pallas as pl
from jax.experimental.pallas import tpu as pltpu


def _round_up(x, m):
    return ((x + m - 1) // m) * m


# --------------------------------------------------------------------------- #
# Kernel 1: loop-invariant encoder projection  uh = enc @ U + b_U              #
# (runs ONCE per source sequence; row-tiled, "parallel" grid)                  #
# --------------------------------------------------------------------------- #
def _attn_enc_proj_kernel(enc2d_ref, Uw_ref, Ub_ref, uh_ref):
    uh_ref[...] = (jnp.dot(enc2d_ref[...], Uw_ref[...],
                           preferred_element_type=jnp.float32)
                   + Ub_ref[...])


def prepare_encoder(params, enc_outputs, *, batch_pad=8, row_tile=512):
    """One-time, per-sequence work.

    enc_outputs: (S, B, D) time-major (PyTorch layout).
    Returns batch-major, sublane-padded encoder outputs (Bp, S, D) and the
    precomputed attention projection uh (Bp, S, H)."""
    S, B, D = enc_outputs.shape
    H = params["attn_Uw"].shape[1]
    Bp = _round_up(max(B, batch_pad), batch_pad)

    enc_bsd = jnp.transpose(enc_outputs, (1, 0, 2))            # (B, S, D), batch-major
    if Bp != B:
        enc_bsd = jnp.pad(enc_bsd, ((0, Bp - B), (0, 0), (0, 0)))

    rows = Bp * S
    tile = min(row_tile, _round_up(rows, 8))
    rows_p = _round_up(rows, tile)
    enc2d = enc_bsd.reshape(rows, D)
    if rows_p != rows:
        enc2d = jnp.pad(enc2d, ((0, rows_p - rows), (0, 0)))

    uh2d = pl.pallas_call(
        _attn_enc_proj_kernel,
        out_shape=jax.ShapeDtypeStruct((rows_p, H), jnp.float32),
        grid=(rows_p // tile,),
        in_specs=[pl.BlockSpec((tile, D), lambda i: (i, 0)),
                  pl.BlockSpec((D, H), lambda i: (0, 0)),
                  pl.BlockSpec((1, H), lambda i: (0, 0))],
        out_specs=pl.BlockSpec((tile, H), lambda i: (i, 0)),
        compiler_params=pltpu.CompilerParams(
            dimension_semantics=("parallel",)),
    )(enc2d, params["attn_Uw"], params["attn_Ub"])
    return enc_bsd, uh2d[:rows].reshape(Bp, S, H)


# --------------------------------------------------------------------------- #
# Kernel 2: fused multi-step decoder (attention + combine + GRU cell per step) #
# grid = (batch_blocks ["parallel"], T ["arbitrary"]); h carried in VMEM       #
# --------------------------------------------------------------------------- #
def _decoder_fused_kernel(prev_y_ref, h0_ref, enc_ref, uh_ref,
                          attn_vw_ref, comb_W_ref, comb_b_ref,
                          gru_W_ref, gru_b_ref,
                          hseq_ref, attnw_ref,
                          h_carry):
    t = pl.program_id(1)

    @pl.when(t == 0)
    def _():
        h_carry[...] = h0_ref[...]

    prev_y = prev_y_ref[0]                       # (bB, E)  (time dim of the block)
    prev_h = h_carry[...]                        # (bB, H)  carried across steps
    enc = enc_ref[...]                           # (bB, S, D)  VMEM-resident across t
    uh = uh_ref[...]                             # (bB, S, H)  VMEM-resident across t
    H = uh.shape[-1]

    # ---- AttnBahd (additive attention), batch-major; vb dropped (shift-invariant) --
    wquh = jnp.tanh(uh + prev_h[:, None, :])                            # (bB, S, H)
    scores = jnp.sum(wquh * attn_vw_ref[...][None, :, :], axis=-1)      # (bB, S)
    m = jnp.max(scores, axis=-1, keepdims=True)
    e = jnp.exp(scores - m)
    # exact reciprocal keeps the tight check vs the f32 reference; approx=True in prod.
    attn = e * pl.reciprocal(jnp.sum(e, axis=-1, keepdims=True), approx=False)
    attnw_ref[0] = attn                                                 # (bB, S), lane-direct

    # ---- context = attn-weighted sum of encoder outputs (batched MXU matvec) ------
    context = jnp.einsum("bqs,bsd->bqd", attn[:, None, :], enc,
                         preferred_element_type=jnp.float32)[:, 0, :]   # (bB, D)

    # ---- combine(prev_y, ctx): ONE fused matmul + ReLU -----------------------------
    y_ctx = jnp.concatenate([prev_y, context], axis=-1)                 # (bB, E+D)
    gru_in = jnp.maximum(
        jnp.dot(y_ctx, comb_W_ref[...], preferred_element_type=jnp.float32)
        + comb_b_ref[...], 0.0)                                         # (bB, H)

    # ---- single-layer GRU cell: ONE fused (bB, 2H) @ (2H, 4H) matmul ---------------
    # columns of gru_W are [r | z | n_input | n_hidden]; PyTorch gate math preserved.
    xh = jnp.concatenate([gru_in, prev_h], axis=-1)                     # (bB, 2H)
    g = (jnp.dot(xh, gru_W_ref[...], preferred_element_type=jnp.float32)
         + gru_b_ref[...])                                              # (bB, 4H)
    r = jax.nn.sigmoid(g[:, 0:H])
    z = jax.nn.sigmoid(g[:, H:2 * H])
    n = jnp.tanh(g[:, 2 * H:3 * H] + r * g[:, 3 * H:4 * H])
    h_new = (1.0 - z) * n + z * prev_h                                  # (bB, H)

    h_carry[...] = h_new
    hseq_ref[0] = h_new


def decoder_gru_attn_bahd_decode(params, prev_y_seq, h0, enc_bsd, uh_bsh,
                                 *, batch_block=8):
    """Fused T-step decode (teacher-forced prev_y sequence).

    prev_y_seq: (T, B, E), h0: (B, H); enc_bsd/uh_bsh from prepare_encoder()
    (batch-major, batch-padded to Bp).
    Returns hidden-state sequence (T, B, H) and attention weights (T, B, S)."""
    T, B, E = prev_y_seq.shape
    H = h0.shape[-1]
    Bp, S, D = enc_bsd.shape

    # Pad to Bp ONCE before the loop (sliced back to B once at the end).
    if Bp != B:
        prev_y_seq = jnp.pad(prev_y_seq, ((0, 0), (0, Bp - B), (0, 0)))
        h0 = jnp.pad(h0, ((0, Bp - B), (0, 0)))

    bB = batch_block if (Bp % batch_block == 0) else Bp
    grid = (Bp // bB, T)

    # vmem_limit sized from the double-buffered working set (+headroom), clamped.
    f32 = 4
    per_block = bB * (S * D + S * H + E + 2 * H + S)
    weights = H + (E + D) * H + H + (2 * H) * (4 * H) + 4 * H
    est = f32 * (2 * per_block + weights + bB * H)
    vmem_limit = int(min(max(4 * est, 8 << 20), 32 << 20))

    in_specs = [
        pl.BlockSpec((1, bB, E), lambda b, t: (t, b, 0)),     # prev_y_seq, per step
        pl.BlockSpec((bB, H), lambda b, t: (b, 0)),           # h0 (read at t == 0)
        pl.BlockSpec((bB, S, D), lambda b, t: (b, 0, 0)),     # enc: resident over t
        pl.BlockSpec((bB, S, H), lambda b, t: (b, 0, 0)),     # uh:  resident over t
        pl.BlockSpec((1, H), lambda b, t: (0, 0)),            # attn_vw
        pl.BlockSpec((E + D, H), lambda b, t: (0, 0)),        # comb_W (fused [Wy; Wc])
        pl.BlockSpec((1, H), lambda b, t: (0, 0)),            # comb_b
        pl.BlockSpec((2 * H, 4 * H), lambda b, t: (0, 0)),    # gru_Wf (fused)
        pl.BlockSpec((1, 4 * H), lambda b, t: (0, 0)),        # gru_bf (fused)
    ]
    out_specs = [
        pl.BlockSpec((1, bB, H), lambda b, t: (t, b, 0)),     # hidden per step
        pl.BlockSpec((1, bB, S), lambda b, t: (t, b, 0)),     # attn weights per step
    ]
    out_shape = (jax.ShapeDtypeStruct((T, Bp, H), jnp.float32),
                 jax.ShapeDtypeStruct((T, Bp, S), jnp.float32))

    hseq, attnw = pl.pallas_call(
        _decoder_fused_kernel,
        out_shape=out_shape,
        grid_spec=pltpu.PrefetchScalarGridSpec(
            num_scalar_prefetch=0,
            grid=grid,
            in_specs=in_specs,
            out_specs=out_specs,
            scratch_shapes=[pltpu.VMEM((bB, H), jnp.float32)]),
        compiler_params=pltpu.CompilerParams(
            dimension_semantics=("parallel", "arbitrary"),
            vmem_limit_bytes=vmem_limit),
    )(prev_y_seq, h0, enc_bsd, uh_bsh,
      params["attn_vw"], params["comb_W"], params["comb_b"],
      params["gru_Wf"], params["gru_bf"])

    return hseq[:, :B], attnw[:, :B]


def decoder_gru_attn_bahd_forward(params, prev_y, prev_h, enc_outputs):
    """Module-equivalent single decode step (== fused decode with T = 1).

    prev_y: (B, E), prev_h: (1, B, H), enc_outputs: (S, B, D) time-major.
    Returns (gru_output (1,B,H), gru_hidden (1,B,H), attn_weights (B,S))."""
    enc_bsd, uh_bsh = prepare_encoder(params, enc_outputs)
    hseq, attnw = decoder_gru_attn_bahd_decode(
        params, prev_y[None], prev_h[0], enc_bsd, uh_bsh)
    h = hseq[0][None]
    # 1-layer unidirectional GRU: gru_output == gru_hidden -> single kernel output.
    return h, h, attnw[0]


# --------------------------------------------------------------------------- #
# Parameter init (PyTorch-style), packing for the kernel, pure-JAX reference   #
# --------------------------------------------------------------------------- #
def _init_params(key, input_size, hidden_size, enc_hidden, enc_dirs,
                 attn_input_size, attn_output_size):
    """Deterministic PyTorch-style uniform init; linear weights stored as (in, out);
    GRU gate weights as (in, 3*hidden) in r|z|n order (PyTorch order, transposed)."""
    D = enc_hidden * enc_dirs
    comb_in = input_size + D
    H = hidden_size

    def u(k, shape, fan_in):
        b = 1.0 / math.sqrt(fan_in)
        return jax.random.uniform(k, shape, jnp.float32, -b, b)

    ks = jax.random.split(key, 11)
    return {
        # AttnBahd
        "attn_Uw": u(ks[0], (attn_input_size, attn_output_size), attn_input_size),
        "attn_Ub": u(ks[1], (1, attn_output_size), attn_input_size),
        "attn_vw": u(ks[2], (1, attn_output_size), attn_output_size),
        "attn_vb": u(ks[3], (1, 1), attn_output_size),
        # W_combine_prev_y_ctx, split into the prev_y part and the context part
        "comb_Wy": u(ks[4], (input_size, H), comb_in),
        "comb_Wc": u(ks[5], (D, H), comb_in),
        "comb_b":  u(ks[6], (1, H), comb_in),
        # GRU (PyTorch gate order r, z, n)
        "gru_Wih": u(ks[7], (H, 3 * H), H),
        "gru_Whh": u(ks[8], (H, 3 * H), H),
        "gru_bih": u(ks[9], (1, 3 * H), H),
        "gru_bhh": u(ks[10], (1, 3 * H), H),
    }


def pack_params(p):
    """Pack reference params into the fused-kernel layout:
    comb_W = [Wy; Wc] (E+D, H); gru_Wf (2H, 4H) with column blocks [r | z | n_i | n_h]."""
    H = p["gru_Wih"].shape[0]
    Wih, Whh = p["gru_Wih"], p["gru_Whh"]
    bih, bhh = p["gru_bih"], p["gru_bhh"]
    zero = jnp.zeros((H, H), jnp.float32)
    gru_Wf = jnp.concatenate([
        jnp.concatenate([Wih[:, :H], Wih[:, H:2 * H], Wih[:, 2 * H:], zero], axis=1),
        jnp.concatenate([Whh[:, :H], Whh[:, H:2 * H], zero, Whh[:, 2 * H:]], axis=1),
    ], axis=0)
    gru_bf = jnp.concatenate([bih[:, :H] + bhh[:, :H],
                              bih[:, H:2 * H] + bhh[:, H:2 * H],
                              bih[:, 2 * H:], bhh[:, 2 * H:]], axis=1)
    return {
        "attn_Uw": p["attn_Uw"], "attn_Ub": p["attn_Ub"], "attn_vw": p["attn_vw"],
        "comb_W": jnp.concatenate([p["comb_Wy"], p["comb_Wc"]], axis=0),
        "comb_b": p["comb_b"],
        "gru_Wf": gru_Wf, "gru_bf": gru_bf,
    }


def _reference_step(p, prev_y, prev_h2d, enc):
    """Pure-JAX reference of one decode step (time-major, unfused weights)."""
    S, B, D = enc.shape
    H = prev_h2d.shape[1]
    uh = (enc.reshape(S * B, D) @ p["attn_Uw"] + p["attn_Ub"]).reshape(S, B, H)
    wquh = jnp.tanh(uh + prev_h2d[None])
    scores = jnp.sum(wquh * p["attn_vw"][None], axis=-1) + p["attn_vb"][0, 0]
    attn = jax.nn.softmax(scores, axis=0)                       # (S, B)
    context = jnp.sum(attn[:, :, None] * enc, axis=0)           # (B, D)
    gru_in = jax.nn.relu(prev_y @ p["comb_Wy"] + context @ p["comb_Wc"] + p["comb_b"])
    gi = gru_in @ p["gru_Wih"] + p["gru_bih"]
    gh = prev_h2d @ p["gru_Whh"] + p["gru_bhh"]
    r = jax.nn.sigmoid(gi[:, :H] + gh[:, :H])
    z = jax.nn.sigmoid(gi[:, H:2 * H] + gh[:, H:2 * H])
    n = jnp.tanh(gi[:, 2 * H:] + r * gh[:, 2 * H:])
    h_new = (1.0 - z) * n + z * prev_h2d
    return h_new, attn.T


if __name__ == "__main__":
    # Small shapes consistent with the module
    B = 4           # batch
    S = 8           # source sequence length
    E = 16          # decoder input (embedding) size
    H = 32          # decoder hidden size
    ENC_H = 16      # encoder hidden
    ENC_DIRS = 2    # bidirectional encoder
    D = ENC_H * ENC_DIRS
    T = 3           # decode steps for the fused-loop demonstration

    key = jax.random.PRNGKey(0)
    kp, ky, kh, ke = jax.random.split(key, 4)

    params = _init_params(kp, E, H, ENC_H, ENC_DIRS, D, H)
    kparams = pack_params(params)

    prev_y_seq = jax.random.normal(ky, (T, B, E), jnp.float32)   # teacher-forced inputs
    prev_h = jax.random.normal(kh, (1, B, H), jnp.float32)
    enc_outputs = jax.random.normal(ke, (S, B, D), jnp.float32)

    # One-time per-sequence precompute, then the fused T-step decode loop.
    enc_bsd, uh_bsh = prepare_encoder(kparams, enc_outputs)
    hseq, attnw = decoder_gru_attn_bahd_decode(kparams, prev_y_seq, prev_h[0],
                                               enc_bsd, uh_bsh)
    jax.block_until_ready((hseq, attnw))

    # Module-equivalent single step (same kernel, T = 1).
    gru_out, gru_hid, attn_w0 = decoder_gru_attn_bahd_forward(
        kparams, prev_y_seq[0], prev_h, enc_outputs)
    jax.block_until_ready((gru_out, gru_hid, attn_w0))

    # Pure-JAX multi-step reference.
    h_ref = prev_h[0]
    ref_h, ref_a = [], []
    for t in range(T):
        h_ref, a_ref = _reference_step(params, prev_y_seq[t], h_ref, enc_outputs)
        ref_h.append(h_ref)
        ref_a.append(a_ref)
    ref_h = jnp.stack(ref_h)
    ref_a = jnp.stack(ref_a)

    assert hseq.shape == (T, B, H) and attnw.shape == (T, B, S)
    assert gru_out.shape == (1, B, H) and gru_hid.shape == (1, B, H)
    assert attn_w0.shape == (B, S)
    assert jnp.allclose(hseq, ref_h, atol=1e-4, rtol=1e-4)
    assert jnp.allclose(attnw, ref_a, atol=1e-4, rtol=1e-4)
    assert jnp.allclose(gru_out[0], ref_h[0], atol=1e-4, rtol=1e-4)
    assert jnp.allclose(gru_hid[0], ref_h[0], atol=1e-4, rtol=1e-4)
    assert jnp.allclose(attn_w0, ref_a[0], atol=1e-4, rtol=1e-4)

    print("KERNEL_OK")
</pallas_src>

<mosaic_0001>
module attributes {stable_mosaic.version = 11 : i64} {
  func.func @_attn_enc_proj_kernel(%arg0: i32, %arg1: memref<64x32xf32, #tpu.memory_space<vmem>>, %arg2: memref<32x32xf32, #tpu.memory_space<vmem>>, %arg3: memref<1x32xf32, #tpu.memory_space<vmem>>, %arg4: memref<64x32xf32, #tpu.memory_space<vmem>>) attributes {dimension_semantics = [#tpu.dimension_semantics<parallel>], iteration_bounds = array<i64: 1>, scalar_prefetch = 0 : i64, scratch_operands = 0 : i64, tpu.core_type = #tpu.core_type<tc>, window_params = [{transform_indices = @transform_0, window_bounds = array<i64: 64, 32>}, {pipeline_mode = #tpu.pipeline_mode<synchronous>, transform_indices = @transform_1, window_bounds = array<i64: 32, 32>}, {pipeline_mode = #tpu.pipeline_mode<synchronous>, transform_indices = @transform_2, window_bounds = array<i64: 1, 32>}, {transform_indices = @transform_3, window_bounds = array<i64: 64, 32>}]} {
    %c0 = arith.constant 0 : index
    %c0_0 = arith.constant 0 : index
    %0 = vector.load %arg1[%c0, %c0_0] : memref<64x32xf32, #tpu.memory_space<vmem>>, vector<64x32xf32>
    %c0_1 = arith.constant 0 : index
    %c0_2 = arith.constant 0 : index
    %1 = vector.load %arg2[%c0_1, %c0_2] : memref<32x32xf32, #tpu.memory_space<vmem>>, vector<32x32xf32>
    %cst = arith.constant dense<0.000000e+00> : vector<64x32xf32>
    %2 = tpu.matmul %0, %1, %cst {dimension_numbers = #tpu.dot_dimension_numbers<[1], [0], [0], [1], [0, 0, 1, 1], [], []>} : vector<64x32xf32>, vector<32x32xf32>, vector<64x32xf32> -> vector<64x32xf32>
    %c0_3 = arith.constant 0 : index
    %c0_4 = arith.constant 0 : index
    %3 = vector.load %arg3[%c0_3, %c0_4] : memref<1x32xf32, #tpu.memory_space<vmem>>, vector<1x32xf32>
    %4 = vector.broadcast %3 : vector<1x32xf32> to vector<64x32xf32>
    %5 = arith.addf %2, %4 : vector<64x32xf32>
    %c0_5 = arith.constant 0 : index
    %c0_6 = arith.constant 0 : index
    %6 = vector.load %arg4[%c0_5, %c0_6] : memref<64x32xf32, #tpu.memory_space<vmem>>, vector<64x32xf32>
    tpu.vector_store %arg4[%c0_5, %c0_6], %5 {strides = array<i32>} : memref<64x32xf32, #tpu.memory_space<vmem>>, vector<64x32xf32>,
    return
  }
  func.func @transform_0(%arg0: i32) -> (i32, i32) {
    %c0_i32 = arith.constant 0 : i32
    %c0_i32_0 = arith.constant 0 : i32
    return %arg0, %c0_i32 : i32, i32
  }
  func.func @transform_1(%arg0: i32) -> (i32, i32) {
    %c0_i32 = arith.constant 0 : i32
    %c0_i32_0 = arith.constant 0 : i32
    %c0_i32_1 = arith.constant 0 : i32
    return %c0_i32, %c0_i32_0 : i32, i32
  }
  func.func @transform_2(%arg0: i32) -> (i32, i32) {
    %c0_i32 = arith.constant 0 : i32
    %c0_i32_0 = arith.constant 0 : i32
    %c0_i32_1 = arith.constant 0 : i32
    return %c0_i32, %c0_i32_0 : i32, i32
  }
  func.func @transform_3(%arg0: i32) -> (i32, i32) {
    %c0_i32 = arith.constant 0 : i32
    %c0_i32_0 = arith.constant 0 : i32
    return %arg0, %c0_i32 : i32, i32
  }
}

</mosaic_0001>

<bundles_post_ra>
// kernel: tpu_custom_call.1
= control target key start
LH: loop header
LB: loop body
LE: loop exit
PB: predicated region body
PF: predicated region fallthrough
CT: control target
= control target key end

     0   :  { %vm33_vm0 = vcmask 261120   ;;  %s327_s1 = inlined_call_operand.vmem [shape: f32[32,32], index: 1, kind: input, shape index: {}]   ;;  %s328_s0 = inlined_call_operand.vmem [shape: f32[64,32], index: 0, kind: input, shape index: {}]   ;;  %s329_s2 = inlined_call_operand.vmem [shape: f32[1,32], index: 2, kind: input, shape index: {}]   ;;  %s330_s3 = inlined_call_operand.vmem [shape: f32[64,32], index: 3, kind: output, shape index: {}]  }
   0x1   :  { %v22_v0 = vld [vmem:[%s327_s1] sm:$0xff]  ;;  %v23_v1 = vld [vmem:[%s327_s1 + $0x8] sm:$0xff]  ;;  %v24_v2 = vld [vmem:[%s327_s1 + $0x10] sm:$0xff] }
   0x2   :  { %v216_v3 = vpack.c.bf16 %v23_v1, %v22_v0  ;;  %v25_v4 = vld [vmem:[%s327_s1 + $0x18] sm:$0xff]  ;;  %v14_v5 = vld [vmem:[%s328_s0] sm:$0xff]  ;;  %v15_v8 = vld [vmem:[%s328_s0 + $0x8] sm:$0xff] }
   0x3   :  { %v18_v6 = vld [vmem:[%s328_s0 + $0x20] sm:$0xff]  ;;  %v220_v7 = vpack.c.bf16 %v25_v4, %v24_v2  ;;  %204 = vmatprep.mubr.msk.f32.mxu0 %vm33_vm0, %v14_v5  ;;  %v19_v9 = vld [vmem:[%s328_s0 + $0x28] sm:$0xff]  ;;  %v16_v10 = vld [vmem:[%s328_s0 + $0x10] sm:$0xff] }
   0x4   :  { %210 = vmatprep.mubr.msk.f32.mxu1 %vm33_vm0, %v18_v6  ;;  %217 = vmatprep.subr.bf16.mxu0 %v216_v3  ;;  %v20_v11 = vld [vmem:[%s328_s0 + $0x30] sm:$0xff]  ;;  %v17_v12 = vld [vmem:[%s328_s0 + $0x18] sm:$0xff]  ;;  %v175_v14 = vld [vmem:[%s329_s2] ss:$0 sm:$0xff] }
   0x5   :  { %224 = vmatprep.subr.bf16.mxu1 %v216_v3  ;;  %219 = vmatpush3.bf16.msra.mxu0 %v216_v3  ;;  %v21_v13 = vld [vmem:[%s328_s0 + $0x38] sm:$0xff] }
   0x6   :  { %226 = vmatpush3.bf16.msra.mxu1 %v216_v3  ;;  %221 = vmatprep.subr.bf16.mxu0 %v220_v7 }
   0x7   :  { %225 = vmatprep.subr.bf16.mxu1 %v220_v7 }
   0x9   :  { %223 = vmatpush3.bf16.msra.mxu0 %v220_v7 }
   0xa   :  { %227 = vmatpush3.bf16.msra.mxu1 %v220_v7 }
   0xc   :  { %205 = vmatmul.mubr.msk.f32.vlgmr.msra.gmra.mrb[0].mxu0 %vm33_vm0, %v15_v8 }
   0xd   :  { %211 = vmatmul.mubr.msk.f32.vlgmr.msra.gmra.mrb[0].mxu1 %vm33_vm0, %v19_v9  ;;  %207 = vmatprep.mubr.msk.f32.mxu0 %vm33_vm0, %v16_v10 }
   0xe   :  { %213 = vmatprep.mubr.msk.f32.mxu1 %vm33_vm0, %v20_v11 }
  0x10   :  { %208 = vmatmul.mubr.msk.f32.gmra.mrb[2].mxu0 %vm33_vm0, %v17_v12 }
  0x11   :  { %214 = vmatmul.mubr.msk.f32.gmra.mrb[2].mxu1 %vm33_vm0, %v21_v13 }
  0xdf   :  { %v206_v15 = vpop.f32.mrb[0].mxu0 }
  0xe0   :  { %v212_v16 = vpop.f32.mrb[0].mxu1  ;;  %v130_v17 = vadd.f32 %v206_v15, %v175_v14  ;;  %v124_v19 = vpop.f32.mrb[1].mxu0 }
  0xe1   :  { %v150_v18 = vadd.f32 %v212_v16, %v175_v14  ;;  %v144_v20 = vpop.f32.mrb[1].mxu1  ;;  %v125_v21 = vadd.f32 %v175_v14, %v124_v19 }
  0xe2   :  { %v145_v22 = vadd.f32 %v175_v14, %v144_v20  ;;  %164 = vst.msk [vmem:[%s330_s3 + $0x8] sm:$0xff] %vm33_vm0, %v130_v17 }
  0xe3   :  { %168 = vst.msk [vmem:[%s330_s3 + $0x28] sm:$0xff] %vm33_vm0, %v150_v18  ;;  %163 = vst.msk [vmem:[%s330_s3] sm:$0xff] %vm33_vm0, %v125_v21  ;;  %v209_v23 = vpop.f32.mrb[2].mxu0 }
  0xe4   :  { %167 = vst.msk [vmem:[%s330_s3 + $0x20] sm:$0xff] %vm33_vm0, %v145_v22  ;;  %v215_v24 = vpop.f32.mrb[2].mxu1  ;;  %v140_v25 = vadd.f32 %v209_v23, %v175_v14  ;;  %v134_v27 = vpop.f32.mrb[3].mxu0 }
  0xe5   :  { %v160_v26 = vadd.f32 %v215_v24, %v175_v14  ;;  %v154_v28 = vpop.f32.mrb[3].mxu1  ;;  %v135_v29 = vadd.f32 %v175_v14, %v134_v27 }
  0xe6   :  { %v155_v30 = vadd.f32 %v175_v14, %v154_v28  ;;  %166 = vst.msk [vmem:[%s330_s3 + $0x18] sm:$0xff] %vm33_vm0, %v140_v25 }
  0xe7   :  { %170 = vst.msk [vmem:[%s330_s3 + $0x38] sm:$0xff] %vm33_vm0, %v160_v26  ;;  %165 = vst.msk [vmem:[%s330_s3 + $0x10] sm:$0xff] %vm33_vm0, %v135_v29 }
  0xe8   :  { %169 = vst.msk [vmem:[%s330_s3 + $0x30] sm:$0xff] %vm33_vm0, %v155_v30 }

</bundles_post_ra>
